<compile_context>
chip_gen: v6e
topology: v6e:2x2x1
jax: 0.10.0
libtpu: 0.0.40
codegen_flags: <defaults>
</compile_context>

<pallas_src>
import jax
import jax.numpy as jnp
from jax.experimental import pallas as pl
from jax.experimental.pallas import tpu as pltpu

_BN_EPS = 1e-5
_TS_MAX = 2048              # max spatial lanes per tile (multiple of 128)
_TARGET_TILE_ELEMS = 512 * 1024   # ~2 MiB of f32 per streamed block


def _round_up(x, m):
    return (x + m - 1) // m * m


# ---------------------------------------------------------------------------
# 1) Gate computation: t1/t2 = BN(Linear(metadata)).  Tiny, one VMEM block.
# ---------------------------------------------------------------------------
def _gates_kernel(md_ref,
                  wf_ref, bf_ref, gf_ref, betaf_ref,
                  wg_ref, bg_ref, gg_ref, betag_ref,
                  t1_ref, t2_ref):
    md = md_ref[...]                                            # (B, M)

    def linear_bn(w_ref, b_ref, g_ref, beta_ref):
        z = jnp.dot(md, w_ref[...], preferred_element_type=jnp.float32) + b_ref[...]
        mean = jnp.mean(z, axis=0, keepdims=True)               # batch stats
        var = jnp.mean((z - mean) ** 2, axis=0, keepdims=True)  # biased var
        return (z - mean) * jax.lax.rsqrt(var + _BN_EPS) * g_ref[...] + beta_ref[...]

    t1_ref[...] = linear_bn(wf_ref, bf_ref, gf_ref, betaf_ref)
    t2_ref[...] = linear_bn(wg_ref, bg_ref, gg_ref, betag_ref)


def _compute_gates(md, params):
    B = md.shape[0]
    C = params["wf"].shape[1]
    vmem = pl.BlockSpec(memory_space=pltpu.MemorySpace.VMEM)
    args = (md,
            params["wf"], params["bf"], params["gf"], params["betaf"],
            params["wg"], params["bg"], params["gg"], params["betag"])
    return pl.pallas_call(
        _gates_kernel,
        out_shape=(jax.ShapeDtypeStruct((B, C), jnp.float32),
                   jax.ShapeDtypeStruct((B, C), jnp.float32)),
        in_specs=[vmem] * len(args),
        out_specs=(vmem, vmem),
    )(*args)


# ---------------------------------------------------------------------------
# 2) Streamed gating: out = sigmoid(tanh(feats * t1) + t2), tiled & pipelined.
# ---------------------------------------------------------------------------
def _gate_apply_kernel(feats_ref, t1_ref, t2_ref, out_ref):
    # feats_ref: (RT, TS)   t1/t2: (RT, 1) — broadcast along lanes.
    x = feats_ref[...].astype(jnp.float32)
    y = jnp.tanh(x * t1_ref[...]) + t2_ref[...]
    # sigmoid(y) == 0.5 * (1 + tanh(y / 2)): 2 EUP transcendentals, not 3.
    out_ref[...] = 0.5 * jnp.tanh(0.5 * y) + 0.5


def meta_block(feats, metadata, params):
    """feats: (B, C, H, W), metadata: (B, M). Returns (B, C, H, W) float32."""
    B, C, H, W = feats.shape
    R, S = B * C, H * W

    # Gate values (B, C) computed once, outside the streamed path.
    t1, t2 = _compute_gates(metadata.astype(jnp.float32), params)
    t1r = t1.reshape(R, 1)
    t2r = t2.reshape(R, 1)

    # Flatten to (B*C, H*W): packed sublanes (even for C < 8), lane-dense S.
    # Pure metadata reshape — no HBM copy.
    feats2 = feats.reshape(R, S)

    # Tile selection: (8, 128)-aligned, balanced across the grid, ~2 MiB f32
    # per streamed block (double-buffered in+out ≈ 8 MiB, fits every
    # generation's scoped-VMEM default).  Ragged edges are left to Pallas'
    # masked boundary blocks — no explicit padding copies in HBM.
    ns = pl.cdiv(_round_up(S, 128), _TS_MAX)
    TS = _round_up(pl.cdiv(S, ns), 128)
    rt_cap = max(8, (_TARGET_TILE_ELEMS // TS) // 8 * 8)
    nr = pl.cdiv(_round_up(R, 8), rt_cap)
    RT = _round_up(pl.cdiv(R, nr), 8)
    grid = (pl.cdiv(R, RT), pl.cdiv(S, TS))

    out = pl.pallas_call(
        _gate_apply_kernel,
        out_shape=jax.ShapeDtypeStruct((R, S), jnp.float32),
        grid_spec=pltpu.PrefetchScalarGridSpec(
            num_scalar_prefetch=0,
            grid=grid,
            in_specs=[
                pl.BlockSpec((RT, TS), lambda i, j: (i, j)),
                pl.BlockSpec((RT, 1), lambda i, j: (i, 0)),
                pl.BlockSpec((RT, 1), lambda i, j: (i, 0)),
            ],
            out_specs=pl.BlockSpec((RT, TS), lambda i, j: (i, j)),
        ),
        compiler_params=pltpu.CompilerParams(
            dimension_semantics=("parallel", "parallel")),
    )(feats2, t1r, t2r)

    return out.reshape(B, C, H, W)


# ---------------------------------------------------------------------------
# Params + pure-JAX reference
# ---------------------------------------------------------------------------
def init_params(key, n_feats, n_metadata):
    ks = jax.random.split(key, 8)
    # Linear weights stored transposed as (M, C) so the kernel does md @ W.
    scale = 1.0 / jnp.sqrt(jnp.float32(n_metadata))
    return {
        "wf": jax.random.uniform(ks[0], (n_metadata, n_feats), jnp.float32, -scale, scale),
        "bf": jax.random.uniform(ks[1], (1, n_feats), jnp.float32, -scale, scale),
        "gf": 1.0 + 0.1 * jax.random.normal(ks[2], (1, n_feats), jnp.float32),
        "betaf": 0.1 * jax.random.normal(ks[3], (1, n_feats), jnp.float32),
        "wg": jax.random.uniform(ks[4], (n_metadata, n_feats), jnp.float32, -scale, scale),
        "bg": jax.random.uniform(ks[5], (1, n_feats), jnp.float32, -scale, scale),
        "gg": 1.0 + 0.1 * jax.random.normal(ks[6], (1, n_feats), jnp.float32),
        "betag": 0.1 * jax.random.normal(ks[7], (1, n_feats), jnp.float32),
    }


def meta_block_ref(feats, metadata, p):
    def linear_bn(w, b, g, beta):
        z = metadata.astype(jnp.float32) @ w + b
        mean = jnp.mean(z, axis=0, keepdims=True)
        var = jnp.mean((z - mean) ** 2, axis=0, keepdims=True)
        return (z - mean) / jnp.sqrt(var + _BN_EPS) * g + beta

    t1 = linear_bn(p["wf"], p["bf"], p["gf"], p["betaf"])[:, :, None, None]
    t2 = linear_bn(p["wg"], p["bg"], p["gg"], p["betag"])[:, :, None, None]
    return jax.nn.sigmoid(jnp.tanh(feats.astype(jnp.float32) * t1) + t2)


if __name__ == "__main__":
    key = jax.random.PRNGKey(0)

    # --- small test matching the module defaults: B=2, C=4 feats, 16x16 ---
    B, C, H, W, M = 2, 4, 16, 16, 8
    k_feats, k_md, k_params, key = jax.random.split(key, 4)
    feats = jax.random.normal(k_feats, (B, C, H, W), jnp.float32)
    metadata = jax.random.normal(k_md, (B, M), jnp.float32)
    params = init_params(k_params, C, M)

    out = jax.block_until_ready(meta_block(feats, metadata, params))
    ref = meta_block_ref(feats, metadata, params)
    assert out.shape == (B, C, H, W)
    assert jnp.allclose(out, ref, atol=1e-5, rtol=1e-5), "mismatch vs JAX reference (small)"

    # --- second shape exercising the tiled / masked-edge streaming path ---
    B2, C2, H2, W2 = 2, 8, 40, 40          # R=16 rows, S=1600 -> ragged spatial tiles
    k_feats2, k_md2, k_params2, key = jax.random.split(key, 4)
    feats2 = jax.random.normal(k_feats2, (B2, C2, H2, W2), jnp.float32)
    metadata2 = jax.random.normal(k_md2, (B2, M), jnp.float32)
    params2 = init_params(k_params2, C2, M)

    out2 = jax.block_until_ready(meta_block(feats2, metadata2, params2))
    ref2 = meta_block_ref(feats2, metadata2, params2)
    assert out2.shape == (B2, C2, H2, W2)
    assert jnp.allclose(out2, ref2, atol=1e-5, rtol=1e-5), "mismatch vs JAX reference (tiled)"

    print("KERNEL_OK")
</pallas_src>

<mosaic_0001>
module attributes {stable_mosaic.version = 11 : i64} {
  func.func @_gates_kernel(%arg0: memref<2x8xf32, #tpu.memory_space<vmem>>, %arg1: memref<8x4xf32, #tpu.memory_space<vmem>>, %arg2: memref<1x4xf32, #tpu.memory_space<vmem>>, %arg3: memref<1x4xf32, #tpu.memory_space<vmem>>, %arg4: memref<1x4xf32, #tpu.memory_space<vmem>>, %arg5: memref<8x4xf32, #tpu.memory_space<vmem>>, %arg6: memref<1x4xf32, #tpu.memory_space<vmem>>, %arg7: memref<1x4xf32, #tpu.memory_space<vmem>>, %arg8: memref<1x4xf32, #tpu.memory_space<vmem>>, %arg9: memref<2x4xf32, #tpu.memory_space<vmem>>, %arg10: memref<2x4xf32, #tpu.memory_space<vmem>>) attributes {dimension_semantics = [], scalar_prefetch = 0 : i64, scratch_operands = 0 : i64, tpu.core_type = #tpu.core_type<tc>} {
    %c0 = arith.constant 0 : index
    %c0_0 = arith.constant 0 : index
    %0 = vector.load %arg0[%c0, %c0_0] : memref<2x8xf32, #tpu.memory_space<vmem>>, vector<2x8xf32>
    %c0_1 = arith.constant 0 : index
    %c0_2 = arith.constant 0 : index
    %1 = vector.load %arg1[%c0_1, %c0_2] : memref<8x4xf32, #tpu.memory_space<vmem>>, vector<8x4xf32>
    %cst = arith.constant dense<0.000000e+00> : vector<2x4xf32>
    %2 = tpu.matmul %0, %1, %cst {dimension_numbers = #tpu.dot_dimension_numbers<[1], [0], [0], [1], [0, 0, 1, 1], [], []>} : vector<2x8xf32>, vector<8x4xf32>, vector<2x4xf32> -> vector<2x4xf32>
    %c0_3 = arith.constant 0 : index
    %c0_4 = arith.constant 0 : index
    %3 = vector.load %arg2[%c0_3, %c0_4] : memref<1x4xf32, #tpu.memory_space<vmem>>, vector<1x4xf32>
    %4 = vector.broadcast %3 : vector<1x4xf32> to vector<2x4xf32>
    %5 = arith.addf %2, %4 : vector<2x4xf32>
    %cst_5 = arith.constant dense<0.000000e+00> : vector<4xf32>
    %6 = vector.multi_reduction <add>, %5, %cst_5 [0] : vector<2x4xf32> to vector<4xf32>
    %7 = vector.shape_cast %6 : vector<4xf32> to vector<1x4xf32>
    %cst_6 = arith.constant 2.000000e+00 : f32
    %8 = vector.broadcast %cst_6 : f32 to vector<1x4xf32>
    %9 = arith.divf %7, %8 : vector<1x4xf32>
    %10 = vector.broadcast %9 : vector<1x4xf32> to vector<2x4xf32>
    %11 = arith.subf %5, %10 : vector<2x4xf32>
    %12 = arith.mulf %11, %11 : vector<2x4xf32>
    %cst_7 = arith.constant dense<0.000000e+00> : vector<4xf32>
    %13 = vector.multi_reduction <add>, %12, %cst_7 [0] : vector<2x4xf32> to vector<4xf32>
    %14 = vector.shape_cast %13 : vector<4xf32> to vector<1x4xf32>
    %cst_8 = arith.constant 2.000000e+00 : f32
    %15 = vector.broadcast %cst_8 : f32 to vector<1x4xf32>
    %16 = arith.divf %14, %15 : vector<1x4xf32>
    %17 = vector.broadcast %9 : vector<1x4xf32> to vector<2x4xf32>
    %18 = arith.subf %5, %17 : vector<2x4xf32>
    %cst_9 = arith.constant 9.99999974E-6 : f32
    %19 = vector.broadcast %cst_9 : f32 to vector<1x4xf32>
    %20 = arith.addf %16, %19 : vector<1x4xf32>
    %21 = math.rsqrt %20 : vector<1x4xf32>
    %22 = vector.broadcast %21 : vector<1x4xf32> to vector<2x4xf32>
    %23 = arith.mulf %18, %22 : vector<2x4xf32>
    %c0_10 = arith.constant 0 : index
    %c0_11 = arith.constant 0 : index
    %24 = vector.load %arg3[%c0_10, %c0_11] : memref<1x4xf32, #tpu.memory_space<vmem>>, vector<1x4xf32>
    %25 = vector.broadcast %24 : vector<1x4xf32> to vector<2x4xf32>
    %26 = arith.mulf %23, %25 : vector<2x4xf32>
    %c0_12 = arith.constant 0 : index
    %c0_13 = arith.constant 0 : index
    %27 = vector.load %arg4[%c0_12, %c0_13] : memref<1x4xf32, #tpu.memory_space<vmem>>, vector<1x4xf32>
    %28 = vector.broadcast %27 : vector<1x4xf32> to vector<2x4xf32>
    %29 = arith.addf %26, %28 : vector<2x4xf32>
    %c0_14 = arith.constant 0 : index
    %c0_15 = arith.constant 0 : index
    %30 = vector.load %arg9[%c0_14, %c0_15] : memref<2x4xf32, #tpu.memory_space<vmem>>, vector<2x4xf32>
    tpu.vector_store %arg9[%c0_14, %c0_15], %29 {strides = array<i32>} : memref<2x4xf32, #tpu.memory_space<vmem>>, vector<2x4xf32>,
    %c0_16 = arith.constant 0 : index
    %c0_17 = arith.constant 0 : index
    %31 = vector.load %arg5[%c0_16, %c0_17] : memref<8x4xf32, #tpu.memory_space<vmem>>, vector<8x4xf32>
    %cst_18 = arith.constant dense<0.000000e+00> : vector<2x4xf32>
    %32 = tpu.matmul %0, %31, %cst_18 {dimension_numbers = #tpu.dot_dimension_numbers<[1], [0], [0], [1], [0, 0, 1, 1], [], []>} : vector<2x8xf32>, vector<8x4xf32>, vector<2x4xf32> -> vector<2x4xf32>
    %c0_19 = arith.constant 0 : index
    %c0_20 = arith.constant 0 : index
    %33 = vector.load %arg6[%c0_19, %c0_20] : memref<1x4xf32, #tpu.memory_space<vmem>>, vector<1x4xf32>
    %34 = vector.broadcast %33 : vector<1x4xf32> to vector<2x4xf32>
    %35 = arith.addf %32, %34 : vector<2x4xf32>
    %cst_21 = arith.constant dense<0.000000e+00> : vector<4xf32>
    %36 = vector.multi_reduction <add>, %35, %cst_21 [0] : vector<2x4xf32> to vector<4xf32>
    %37 = vector.shape_cast %36 : vector<4xf32> to vector<1x4xf32>
    %cst_22 = arith.constant 2.000000e+00 : f32
    %38 = vector.broadcast %cst_22 : f32 to vector<1x4xf32>
    %39 = arith.divf %37, %38 : vector<1x4xf32>
    %40 = vector.broadcast %39 : vector<1x4xf32> to vector<2x4xf32>
    %41 = arith.subf %35, %40 : vector<2x4xf32>
    %42 = arith.mulf %41, %41 : vector<2x4xf32>
    %cst_23 = arith.constant dense<0.000000e+00> : vector<4xf32>
    %43 = vector.multi_reduction <add>, %42, %cst_23 [0] : vector<2x4xf32> to vector<4xf32>
    %44 = vector.shape_cast %43 : vector<4xf32> to vector<1x4xf32>
    %cst_24 = arith.constant 2.000000e+00 : f32
    %45 = vector.broadcast %cst_24 : f32 to vector<1x4xf32>
    %46 = arith.divf %44, %45 : vector<1x4xf32>
    %47 = vector.broadcast %39 : vector<1x4xf32> to vector<2x4xf32>
    %48 = arith.subf %35, %47 : vector<2x4xf32>
    %cst_25 = arith.constant 9.99999974E-6 : f32
    %49 = vector.broadcast %cst_25 : f32 to vector<1x4xf32>
    %50 = arith.addf %46, %49 : vector<1x4xf32>
    %51 = math.rsqrt %50 : vector<1x4xf32>
    %52 = vector.broadcast %51 : vector<1x4xf32> to vector<2x4xf32>
    %53 = arith.mulf %48, %52 : vector<2x4xf32>
    %c0_26 = arith.constant 0 : index
    %c0_27 = arith.constant 0 : index
    %54 = vector.load %arg7[%c0_26, %c0_27] : memref<1x4xf32, #tpu.memory_space<vmem>>, vector<1x4xf32>
    %55 = vector.broadcast %54 : vector<1x4xf32> to vector<2x4xf32>
    %56 = arith.mulf %53, %55 : vector<2x4xf32>
    %c0_28 = arith.constant 0 : index
    %c0_29 = arith.constant 0 : index
    %57 = vector.load %arg8[%c0_28, %c0_29] : memref<1x4xf32, #tpu.memory_space<vmem>>, vector<1x4xf32>
    %58 = vector.broadcast %57 : vector<1x4xf32> to vector<2x4xf32>
    %59 = arith.addf %56, %58 : vector<2x4xf32>
    %c0_30 = arith.constant 0 : index
    %c0_31 = arith.constant 0 : index
    %60 = vector.load %arg10[%c0_30, %c0_31] : memref<2x4xf32, #tpu.memory_space<vmem>>, vector<2x4xf32>
    tpu.vector_store %arg10[%c0_30, %c0_31], %59 {strides = array<i32>} : memref<2x4xf32, #tpu.memory_space<vmem>>, vector<2x4xf32>,
    return
  }
}

</mosaic_0001>

<bundles_post_ra>
// kernel: tpu_custom_call.1
= control target key start
LH: loop header
LB: loop body
LE: loop exit
PB: predicated region body
PF: predicated region fallthrough
CT: control target
= control target key end

     0   :  { %16 = vsyncpa [#allocation3], 0  ;;  %v377_v2 = vmov 0.0   ;;  %vm45_vm0 = vcmask 64512   ;;  %s475_s0 = inlined_call_operand.vmem [shape: f32[2,8], index: 0, kind: input, shape index: {}]   ;;  %s476_s1 = inlined_call_operand.vmem [shape: f32[8,4], index: 1, kind: input, shape index: {}]   ;;  %s477_s2 = inlined_call_operand.vmem [shape: f32[1,4], index: 2, kind: input, shape index: {}]   ;;  %s478_s3 = inlined_call_operand.vmem [shape: f32[1,4], index: 3, kind: input, shape index: {}]   ;;  %s479_s4 = inlined_call_operand.vmem [shape: f32[1,4], index: 4, kind: input, shape index: {}]   ;;  %s480_s5 = inlined_call_operand.vmem [shape: f32[8,4], index: 5, kind: input, shape index: {}]   ;;  %s481_s6 = inlined_call_operand.vmem [shape: f32[1,4], index: 6, kind: input, shape index: {}]   ;;  %s482_s7 = inlined_call_operand.vmem [shape: f32[1,4], index: 7, kind: input, shape index: {}]   ;;  %s483_s8 = inlined_call_operand.vmem [shape: f32[1,4], index: 8, kind: input, shape index: {}]   ;;  %s484_s9 = inlined_call_operand.hbm [shape: f32[2,4], index: 9, kind: output, shape index: {0}]   ;;  %s485_s10 = inlined_call_operand.hbm [shape: f32[2,4], index: 10, kind: output, shape index: {1}]  }
   0x1   :  { %v37_v0 = vld [vmem:[%s476_s1] sm:$0xff]  ;;  %315 = vmatprep.subr.mxu0 %v377_v2  ;;  %320 = vmatprep.subr.mxu1 %v377_v2 }
   0x2   :  { %v159_v1 = vld [vmem:[%s480_s5] sm:$0xff] }
   0x3   :  { %v36_v3 = vld [vmem:[%s475_s0] sm:$0x3] }
   0x4   :  { %17 = vsyncpa [#allocation5], 0  ;;  %316 = vmatpush3.msra.mxu0 %v37_v0  ;;  %vm378_vm1 = vmmov 0   ;;  %321 = vmatpush3.msra.mxu1 %v159_v1  ;;  %v303_v4 = vld [vmem:[%s477_s2] ss:$0 sm:$0xff]  ;;  %vm119_vm2 = vcmask 25600  }
   0x5   :  { %317 = vmatprep.mubr.msk.f32.mxu0 %vm378_vm1, %v377_v2  ;;  %322 = vmatprep.mubr.msk.f32.mxu1 %vm378_vm1, %v377_v2  ;;  %v307_v5 = vld [vmem:[%s481_s6] ss:$0 sm:$0xff]  ;;  %s379_s24 = smov [#allocation2]   ;;  %s380_s28 = smov [#allocation4]  }
   0x6   :  { %318 = vmatmul.mubr.msk.f32.vlgmr.msra.gmra.mxu0 %vm45_vm0, %v36_v3  ;;  %323 = vmatmul.mubr.msk.f32.vlgmr.msra.gmra.mxu1 %vm45_vm0, %v36_v3  ;;  %v305_v51 = vld [vmem:[%s478_s3] ss:$0 sm:$0xff]  ;;  %s281_s25 = sshll.u32 %s379_s24, 4  ;;  %s291_s3 = sshll.u32 %s380_s28, 4  ;;  %s282_s25 = int_to_ptr.vmem [resolvable:$true] %s281_s25  ;;  %s292_s3 = int_to_ptr.vmem [resolvable:$true] %s291_s3 }
   0x7   :  { %v309_v54 = vld [vmem:[%s482_s7] ss:$0 sm:$0xff]  ;;  %s333_s7 = scalar_lea.vmem %s282_s25, 32  ;;  %p338_p1 = scmp.lt.s32.totalorder %s282_s25, %s282_s25 }
   0x8   :  { %v306_v56 = vld [vmem:[%s479_s4] ss:$0 sm:$0xff]  ;;  %p334_p0 = scmp.ne.s32.totalorder %s282_s25, %s333_s7  ;;  %p339_p2 = scmp.lt.s32.totalorder %s333_s7, %s333_s7 }
   0x9   :  { %v310_v58 = vld [vmem:[%s483_s8] ss:$0 sm:$0xff] }
   0xa   :  { %p340_p3 = por %p339_p2, %p338_p1 }
   0xc   :  { %p341_p4 = pnand %p340_p3, %p334_p0 }
  0xc6   :  { %v115_v6 = vpop.f32.mrf.mxu0  ;;  %v233_v7 = vpop.f32.mrf.mxu1 }
  0xc7   :  { %v116_v8 = vadd.f32 %v303_v4, %v115_v6  ;;  %v234_v9 = vadd.f32 %v307_v5, %v233_v7 }
  0xc8   :  { %v319_v10 = vpop.f32.mrf.mxu0  ;;  %v324_v11 = vpop.f32.mrf.mxu1 }
  0xc9   :  { %v120_v12 = vsel %vm119_vm2, %v116_v8, 0.0  ;;  %v237_v13 = vsel %vm119_vm2, %v234_v9, 0.0 }
  0xca   :  { %v121_v14 = vrot.slane %v120_v12, 4  ;;  %v238_v15 = vrot.slane %v237_v13, 4 }
  0xcc   :  { %v122_v16 = vadd.f32 %v121_v14, %v120_v12  ;;  %v239_v17 = vadd.f32 %v238_v15, %v237_v13 }
  0xce   :  { %v123_v18 = vrot.slane %v122_v16, 2  ;;  %v240_v19 = vrot.slane %v239_v17, 2 }
  0xd0   :  { %v124_v20 = vadd.f32 %v123_v18, %v122_v16  ;;  %v241_v21 = vadd.f32 %v240_v19, %v239_v17 }
  0xd2   :  { %v125_v22 = vrot.slane %v124_v20, 1  ;;  %v242_v23 = vrot.slane %v241_v21, 1 }
  0xd4   :  { %v126_v24 = vadd.f32 %v125_v22, %v124_v20  ;;  %v243_v25 = vadd.f32 %v242_v23, %v241_v21 }
  0xd6   :  { %v128_v26 = vmul.f32 0.5, %v126_v24  ;;  %v244_v27 = vmul.f32 0.5, %v243_v25 }
  0xd8   :  { %v129_v28 = vsub.f32 %v116_v8, %v128_v26  ;;  %v245_v29 = vsub.f32 %v234_v9, %v244_v27 }
  0xda   :  { %v130_v30 = vmul.f32 %v129_v28, %v129_v28  ;;  %v246_v31 = vmul.f32 %v245_v29, %v245_v29 }
  0xdc   :  { %v131_v32 = vsel %vm119_vm2, %v130_v30, 0.0  ;;  %v247_v33 = vsel %vm119_vm2, %v246_v31, 0.0 }
  0xdd   :  { %v132_v34 = vrot.slane %v131_v32, 4  ;;  %v248_v35 = vrot.slane %v247_v33, 4 }
  0xdf   :  { %v133_v36 = vadd.f32 %v132_v34, %v131_v32  ;;  %v249_v37 = vadd.f32 %v248_v35, %v247_v33 }
  0xe1   :  { %v134_v38 = vrot.slane %v133_v36, 2  ;;  %v250_v39 = vrot.slane %v249_v37, 2 }
  0xe3   :  { %v135_v40 = vadd.f32 %v134_v38, %v133_v36  ;;  %v251_v41 = vadd.f32 %v250_v39, %v249_v37 }
  0xe5   :  { %v136_v42 = vrot.slane %v135_v40, 1  ;;  %v252_v43 = vrot.slane %v251_v41, 1 }
  0xe7   :  { %v137_v44 = vadd.f32 %v136_v42, %v135_v40  ;;  %v253_v45 = vadd.f32 %v252_v43, %v251_v41 }
  0xe9   :  { %v138_v46 = vmul.f32 0.5, %v137_v44  ;;  %v254_v47 = vmul.f32 0.5, %v253_v45 }
  0xeb   :  { %v139_v48 = vadd.f32 1e-05, %v138_v46  ;;  %v255_v49 = vadd.f32 1e-05, %v254_v47 }
  0xed   :  { %329 = vrsqrt.f32 %v139_v48 }
  0xee   :  { %331 = vrsqrt.f32 %v255_v49 }
  0xfa   :  { %v330_v50 = vpop.eup %329 }
  0xfb   :  { %v332_v52 = vpop.eup %331  ;;  %v141_v53 = vmul.f32 %v330_v50, %v129_v28 }
  0xfc   :  { %v257_v55 = vmul.f32 %v332_v52, %v245_v29 }
  0xfd   :  { %v149_v57 = vmul.f32 %v305_v51, %v141_v53 }
  0xfe   :  { %v265_v59 = vmul.f32 %v309_v54, %v257_v55 }
  0xff   :  { %v157_v60 = vadd.f32 %v306_v56, %v149_v57 }
 0x100   :  { %v273_v61 = vadd.f32 %v310_v58, %v265_v59 }
 0x101   :  { %158 = vst.msk [vmem:[#allocation2] sm:$0x3] %vm119_vm2, %v157_v60 }
 0x102   :  { %344 = shalt.err (!%p341_p4)
}
 0x103   :  { %284 = dma.vmem_to_hbm [thread:$0]  %s282_s25, 32, %s484_s9, [#allocation3]   ;;  %274 = vst.msk [vmem:[#allocation4] sm:$0x3] %vm119_vm2, %v273_v61 }
 0x104   :  { %s353_s8 = scalar_lea.vmem %s292_s3, 32  ;;  %p358_p6 = scmp.lt.s32.totalorder %s292_s3, %s292_s3 }
 0x105   :  { %p354_p5 = scmp.ne.s32.totalorder %s292_s3, %s353_s8  ;;  %p359_p7 = scmp.lt.s32.totalorder %s353_s8, %s353_s8 }
 0x107   :  { %p360_p8 = por %p359_p7, %p358_p6 }
 0x109   :  { %p361_p9 = pnand %p360_p8, %p354_p5 }
 0x10b   :  { %364 = shalt.err (!%p361_p9)
}
 0x10c   :  { %294 = dma.vmem_to_hbm [thread:$0]  %s292_s3, 32, %s485_s10, [#allocation5]  }
 0x10d   :  { %373 = dma.done.wait [#allocation3], 32  }
 0x10e   :  { %374 = vsyncadd [#allocation3], 4294967264 }
 0x10f   :  { %375 = dma.done.wait [#allocation5], 32  }
 0x110   :  { %376 = vsyncadd [#allocation5], 4294967264 }
 0x111   :  { %301 = vsyncpa [#allocation3], 1 }
 0x112   :  { %302 = vsyncpa [#allocation5], 1 }

</bundles_post_ra>
